<compile_context>
chip_gen: v5e
topology: v5e:2x2
jax: 0.10.0
libtpu: 0.0.40
codegen_flags: <defaults>
</compile_context>

<pallas_src>
import jax
import jax.numpy as jnp
from jax import lax
from jax.experimental import pallas as pl
from jax.experimental.pallas import tpu as pltpu

N_VERTEX = 42            # in {42, 642, 2562, 10242, ...} per the module's assert
CHS = [3, 8, 8, 2]       # chs = [3, 8, 8, out_ch], out_ch = 2
HIDDEN_AGE = 256         # fc_age: Linear(1, 256); gender=False -> chs_0 = 256
BN_EPS = 1e-5
LEAKY_SLOPE = 0.2
# one-ring neighbor offsets of the deterministic stand-in mesh: (v + off) % V
OFFS = (1, 2, 3, N_VERTEX - 1, N_VERTEX - 2, N_VERTEX - 3, 0)

# ---- packed parameter layout: a single [PACK_ROWS, 128] f32 array ---------- #
PACK_ROWS, PACK_COLS = 40, 128
A_ROW, B_ROW, W_ROW = 0, 8, 16   # rows: A (8), B (8), 3x stacked conv weights (8 each)
GAMMA_COL, BIAS_COL = 64, 70     # cols 64..69: (gamma_i, beta_i) pairs; 70..72: conv biases
W_COLS = 7 * 8                   # 7 neighbor groups x 8 sublane-aligned input channels


# ------------------------------- kernel ------------------------------------ #

def _genagenet_kernel(age_ref, pk_ref, out_ref, ring_ref, stack_ref):
    """Whole GenAgeNet forward.  Activations are channel-major [8(pad), V]."""
    V = N_VERTEX
    age = age_ref[0, 0]                                                   # SMEM scalar

    # fc_age -> fc, folded at pack time:  x[c, v] = age * A[c, v] + B[c, v].
    # Rows >= 3 of A/B are zero padding, so x is [8, V] and the padded channel
    # rows stay exactly 0 through BN (their beta pad is 0) and LeakyReLU.
    x = age * pk_ref[A_ROW:A_ROW + 8, 0:V] + pk_ref[B_ROW:B_ROW + 8, 0:V]

    # ---- conv_block: 3 x (BatchNorm1d -> LeakyReLU(0.2) -> onering_conv) --- #
    for i in range(3):
        cout = CHS[i + 1]
        gamma = pk_ref[0:8, GAMMA_COL + 2 * i:GAMMA_COL + 2 * i + 1]      # [8, 1]
        beta = pk_ref[0:8, GAMMA_COL + 2 * i + 1:GAMMA_COL + 2 * i + 2]   # [8, 1]
        bias = pk_ref[0:cout, BIAS_COL + i:BIAS_COL + i + 1]              # [cout, 1]
        w = pk_ref[W_ROW + 8 * i:W_ROW + 8 * i + cout, 0:W_COLS]          # [cout, 56]

        # BatchNorm1d (track_running_stats=False): biased batch stats over the
        # vertex (lane) axis per channel, two-pass variance, affine + LeakyReLU.
        mean = jnp.mean(x, axis=1, keepdims=True)
        d = x - mean
        var = jnp.mean(d * d, axis=1, keepdims=True)
        y = d * lax.rsqrt(var + BN_EPS) * gamma + beta
        y = jnp.where(y >= 0, y, LEAKY_SLOPE * y)                         # [8, V]

        # onering_conv_layer: out[:, v] = sum_k W_k @ y[:, (v + off_k) % V] + b.
        # Doubled ring buffer turns every rolled view into a static lane slice;
        # the 7 shifted copies are stored sublane-aligned (row offset 8k) into
        # one stacked [56, V] operand so the whole conv is a single MXU dot
        # against the group-stride-8 zero-padded weight.
        ring_ref[0:8, 0:V] = y
        ring_ref[0:8, V:2 * V] = y
        ring = ring_ref[...]                                              # [8, 2V]
        for k in range(7):
            stack_ref[8 * k:8 * k + 8, :] = ring[:, OFFS[k]:OFFS[k] + V]
        x = jnp.dot(w, stack_ref[...],
                    preferred_element_type=jnp.float32) + bias            # [cout, V]

    out_ref[...] = x                                                      # [2, V]


# ------------------------------- wrapper ----------------------------------- #

def _cost_estimate():
    conv_flops = 2 * W_COLS * N_VERTEX * (CHS[1] + CHS[2] + CHS[3])
    bn_flops = 3 * 10 * 8 * N_VERTEX
    fc_flops = 2 * 8 * N_VERTEX
    return pl.CostEstimate(
        flops=conv_flops + bn_flops + fc_flops,
        transcendentals=3 * 8,                      # rsqrt per channel per layer
        bytes_accessed=PACK_ROWS * PACK_COLS * 4 + 4 + CHS[3] * N_VERTEX * 4,
    )


@jax.jit
def gen_age_net_forward(age, packed):
    """age: [1, 1] f32, packed: [40, 128] f32 -> [n_vertex, out_ch] f32."""
    out_t = pl.pallas_call(
        _genagenet_kernel,
        out_shape=jax.ShapeDtypeStruct((CHS[3], N_VERTEX), jnp.float32),
        in_specs=[
            pl.BlockSpec(memory_space=pltpu.MemorySpace.SMEM),   # age scalar
            pl.BlockSpec(memory_space=pltpu.MemorySpace.VMEM),   # all parameters
        ],
        out_specs=pl.BlockSpec(memory_space=pltpu.MemorySpace.VMEM),
        scratch_shapes=[
            pltpu.VMEM((8, 2 * N_VERTEX), jnp.float32),          # doubled ring buffer
            pltpu.VMEM((W_COLS, N_VERTEX), jnp.float32),         # stacked conv operand
        ],
        compiler_params=pltpu.CompilerParams(vmem_limit_bytes=4 * 1024 * 1024),
        cost_estimate=_cost_estimate(),
    )(age, packed)
    # channel-major [out_ch, V] -> module layout [V, out_ch] (layout plumbing only)
    return out_t.T


# ------------------------ parameters / structure ---------------------------- #

def make_neigh_orders(n_vertex):
    # TODO(synk): real one-ring neighbor orders come from the icosahedron template
    # mesh files (Get_neighs_order); deterministic structured stand-in here.  With
    # real (unstructured) orders the conv gather would need scalar-prefetched
    # SMEM indices instead of the static lane-slice ring trick.
    v = jnp.arange(n_vertex)
    offs = jnp.array(OFFS)
    return (v[:, None] + offs[None, :]) % n_vertex                        # [V, 7]


def init_params(key):
    ks = jax.random.split(key, 8)

    def linear(k, fan_in, fan_out):
        kw, kb = jax.random.split(k)
        bound = 1.0 / jnp.sqrt(jnp.float32(fan_in))
        w_t = jax.random.uniform(kw, (fan_in, fan_out), jnp.float32, -bound, bound)
        b = jax.random.uniform(kb, (1, fan_out), jnp.float32, -bound, bound)
        return w_t, b

    p = {}
    p["wage_t"], p["bage"] = linear(ks[0], 1, HIDDEN_AGE)
    p["wfc_t"], p["bfc"] = linear(ks[1], HIDDEN_AGE, CHS[0] * N_VERTEX)
    for i in range(3):
        kg, kb = jax.random.split(ks[5 + i])
        # torch default init is gamma=1, beta=0; randomize mildly so the affine
        # path is actually exercised by the correctness check.
        p[f"bn{i}_gamma"] = 1.0 + 0.5 * jax.random.uniform(
            kg, (1, CHS[i]), jnp.float32, -1.0, 1.0)
        p[f"bn{i}_beta"] = 0.5 * jax.random.uniform(
            kb, (1, CHS[i]), jnp.float32, -1.0, 1.0)
        p[f"conv{i}_w_t"], p[f"conv{i}_b"] = linear(ks[2 + i], 7 * CHS[i], CHS[i + 1])
    return p


def pack_params(p):
    """Fold fc_age∘fc and repack everything into one lane-dense kernel input."""
    f32 = jnp.float32
    V = N_VERTEX
    hi = jax.lax.Precision.HIGHEST

    # z = fc(fc_age(age)) = age * A_flat + B_flat   (fc_age has in_features = 1)
    a_flat = jnp.dot(p["wage_t"], p["wfc_t"], precision=hi)               # [1, 3V]
    b_flat = jnp.dot(p["bage"], p["wfc_t"], precision=hi) + p["bfc"]      # [1, 3V]
    # torch.reshape(x, (V, 3)) handoff, transposed to channel-major [3, V].
    a_cm = a_flat.reshape(V, CHS[0]).T
    b_cm = b_flat.reshape(V, CHS[0]).T

    packed = jnp.zeros((PACK_ROWS, PACK_COLS), f32)
    packed = packed.at[A_ROW:A_ROW + CHS[0], 0:V].set(a_cm)
    packed = packed.at[B_ROW:B_ROW + CHS[0], 0:V].set(b_cm)
    for i in range(3):
        cin, cout = CHS[i], CHS[i + 1]
        packed = packed.at[0:cin, GAMMA_COL + 2 * i].set(p[f"bn{i}_gamma"][0])
        packed = packed.at[0:cin, GAMMA_COL + 2 * i + 1].set(p[f"bn{i}_beta"][0])
        packed = packed.at[0:cout, BIAS_COL + i].set(p[f"conv{i}_b"][0])
        # conv weight, channel-major [cout, 7*cin], zero-padded to sublane
        # group stride 8 -> [cout, 56] (matches the stacked activation layout).
        w_cm = p[f"conv{i}_w_t"].T
        for k in range(7):
            packed = packed.at[W_ROW + 8 * i:W_ROW + 8 * i + cout,
                               8 * k:8 * k + cin].set(w_cm[:, k * cin:(k + 1) * cin])
    return packed


# --------------------------- pure-JAX reference ----------------------------- #

def reference_forward(age, params, neigh):
    x = age * params["wage_t"] + params["bage"]
    x = x @ params["wfc_t"] + params["bfc"]
    x = x.reshape(N_VERTEX, CHS[0])
    flat = neigh.reshape(-1)
    for i in range(3):
        mean = x.mean(0, keepdims=True)
        var = ((x - mean) ** 2).mean(0, keepdims=True)
        x = (x - mean) / jnp.sqrt(var + BN_EPS) * params[f"bn{i}_gamma"] \
            + params[f"bn{i}_beta"]
        x = jnp.where(x >= 0, x, LEAKY_SLOPE * x)
        mat = x[flat].reshape(N_VERTEX, 7 * CHS[i])
        x = mat @ params[f"conv{i}_w_t"] + params[f"conv{i}_b"]
    return x


# ---------------------------------- main ------------------------------------ #

if __name__ == "__main__":
    key = jax.random.PRNGKey(0)
    k_params, k_age = jax.random.split(key)

    params = init_params(k_params)
    packed = pack_params(params)
    neigh = make_neigh_orders(N_VERTEX)                  # [V, 7] (reference only)

    age = jax.random.normal(k_age, (1, 1), jnp.float32)  # matches assert [1, 1]

    out = gen_age_net_forward(age, packed)
    out = jax.block_until_ready(out)

    ref = reference_forward(age, params, neigh)
    assert out.shape == (N_VERTEX, CHS[3])
    assert jnp.allclose(out, ref, atol=5e-4, rtol=5e-4), "mismatch vs reference"

    print("KERNEL_OK")
</pallas_src>

<mosaic_0001>
module attributes {stable_mosaic.version = 11 : i64} {
  func.func @_genagenet_kernel(%arg0: memref<1x1xf32, #tpu.memory_space<smem>>, %arg1: memref<40x128xf32, #tpu.memory_space<vmem>>, %arg2: memref<2x42xf32, #tpu.memory_space<vmem>>, %arg3: memref<8x84xf32, #tpu.memory_space<vmem>>, %arg4: memref<56x42xf32, #tpu.memory_space<vmem>>) attributes {dimension_semantics = [], scalar_prefetch = 0 : i64, scratch_operands = 2 : i64, tpu.core_type = #tpu.core_type<tc>} {
    %c0 = arith.constant 0 : index
    %c0_0 = arith.constant 0 : index
    %0 = memref.load %arg0[%c0, %c0_0] : memref<1x1xf32, #tpu.memory_space<smem>>
    %c0_1 = arith.constant 0 : index
    %c0_2 = arith.constant 0 : index
    %1 = vector.load %arg1[%c0_1, %c0_2] : memref<40x128xf32, #tpu.memory_space<vmem>>, vector<8x42xf32>
    %2 = vector.broadcast %0 : f32 to vector<8x42xf32>
    %3 = arith.mulf %2, %1 : vector<8x42xf32>
    %c8 = arith.constant 8 : index
    %c0_3 = arith.constant 0 : index
    %4 = vector.load %arg1[%c8, %c0_3] : memref<40x128xf32, #tpu.memory_space<vmem>>, vector<8x42xf32>
    %5 = arith.addf %3, %4 : vector<8x42xf32>
    %c0_4 = arith.constant 0 : index
    %c64 = arith.constant 64 : index
    %6 = vector.load %arg1[%c0_4, %c64] : memref<40x128xf32, #tpu.memory_space<vmem>>, vector<8x1xf32>
    %c0_5 = arith.constant 0 : index
    %c65 = arith.constant 65 : index
    %7 = vector.load %arg1[%c0_5, %c65] : memref<40x128xf32, #tpu.memory_space<vmem>>, vector<8x1xf32>
    %c0_6 = arith.constant 0 : index
    %c70 = arith.constant 70 : index
    %8 = vector.load %arg1[%c0_6, %c70] : memref<40x128xf32, #tpu.memory_space<vmem>>, vector<8x1xf32>
    %c16 = arith.constant 16 : index
    %c0_7 = arith.constant 0 : index
    %9 = vector.load %arg1[%c16, %c0_7] : memref<40x128xf32, #tpu.memory_space<vmem>>, vector<8x56xf32>
    %cst = arith.constant dense<0.000000e+00> : vector<8xf32>
    %10 = vector.multi_reduction <add>, %5, %cst [1] : vector<8x42xf32> to vector<8xf32>
    %11 = vector.shape_cast %10 : vector<8xf32> to vector<8x1xf32>
    %cst_8 = arith.constant 4.200000e+01 : f32
    %12 = vector.broadcast %cst_8 : f32 to vector<8x1xf32>
    %13 = arith.divf %11, %12 : vector<8x1xf32>
    %14 = vector.broadcast %13 : vector<8x1xf32> to vector<8x42xf32>
    %15 = arith.subf %5, %14 : vector<8x42xf32>
    %16 = arith.mulf %15, %15 : vector<8x42xf32>
    %cst_9 = arith.constant dense<0.000000e+00> : vector<8xf32>
    %17 = vector.multi_reduction <add>, %16, %cst_9 [1] : vector<8x42xf32> to vector<8xf32>
    %18 = vector.shape_cast %17 : vector<8xf32> to vector<8x1xf32>
    %cst_10 = arith.constant 4.200000e+01 : f32
    %19 = vector.broadcast %cst_10 : f32 to vector<8x1xf32>
    %20 = arith.divf %18, %19 : vector<8x1xf32>
    %cst_11 = arith.constant 9.99999974E-6 : f32
    %21 = vector.broadcast %cst_11 : f32 to vector<8x1xf32>
    %22 = arith.addf %20, %21 : vector<8x1xf32>
    %23 = math.rsqrt %22 : vector<8x1xf32>
    %24 = vector.broadcast %23 : vector<8x1xf32> to vector<8x42xf32>
    %25 = arith.mulf %15, %24 : vector<8x42xf32>
    %26 = vector.broadcast %6 : vector<8x1xf32> to vector<8x42xf32>
    %27 = arith.mulf %25, %26 : vector<8x42xf32>
    %28 = vector.broadcast %7 : vector<8x1xf32> to vector<8x42xf32>
    %29 = arith.addf %27, %28 : vector<8x42xf32>
    %cst_12 = arith.constant 0.000000e+00 : f32
    %30 = vector.broadcast %cst_12 : f32 to vector<8x42xf32>
    %31 = arith.cmpf oge, %29, %30 : vector<8x42xf32>
    %cst_13 = arith.constant 2.000000e-01 : f32
    %32 = vector.broadcast %cst_13 : f32 to vector<8x42xf32>
    %33 = arith.mulf %32, %29 : vector<8x42xf32>
    %34 = arith.select %31, %29, %33 : vector<8x42xi1>, vector<8x42xf32>
    %c0_14 = arith.constant 0 : index
    %c0_15 = arith.constant 0 : index
    %35 = vector.load %arg3[%c0_14, %c0_15] : memref<8x84xf32, #tpu.memory_space<vmem>>, vector<8x42xf32>
    tpu.vector_store %arg3[%c0_14, %c0_15], %34 {strides = array<i32>} : memref<8x84xf32, #tpu.memory_space<vmem>>, vector<8x42xf32>,
    %c0_16 = arith.constant 0 : index
    %c42 = arith.constant 42 : index
    %36 = vector.load %arg3[%c0_16, %c42] : memref<8x84xf32, #tpu.memory_space<vmem>>, vector<8x42xf32>
    tpu.vector_store %arg3[%c0_16, %c42], %34 {strides = array<i32>} : memref<8x84xf32, #tpu.memory_space<vmem>>, vector<8x42xf32>,
    %c0_17 = arith.constant 0 : index
    %c0_18 = arith.constant 0 : index
    %37 = vector.load %arg3[%c0_17, %c0_18] : memref<8x84xf32, #tpu.memory_space<vmem>>, vector<8x84xf32>
    %38 = vector.extract_strided_slice %37 {offsets = [0, 1], sizes = [8, 42], strides = [1, 1]} : vector<8x84xf32> to vector<8x42xf32>
    %c0_19 = arith.constant 0 : index
    %c0_20 = arith.constant 0 : index
    %39 = vector.load %arg4[%c0_19, %c0_20] : memref<56x42xf32, #tpu.memory_space<vmem>>, vector<8x42xf32>
    tpu.vector_store %arg4[%c0_19, %c0_20], %38 {strides = array<i32>} : memref<56x42xf32, #tpu.memory_space<vmem>>, vector<8x42xf32>,
    %40 = vector.extract_strided_slice %37 {offsets = [0, 2], sizes = [8, 42], strides = [1, 1]} : vector<8x84xf32> to vector<8x42xf32>
    %c8_21 = arith.constant 8 : index
    %c0_22 = arith.constant 0 : index
    %41 = vector.load %arg4[%c8_21, %c0_22] : memref<56x42xf32, #tpu.memory_space<vmem>>, vector<8x42xf32>
    tpu.vector_store %arg4[%c8_21, %c0_22], %40 {strides = array<i32>} : memref<56x42xf32, #tpu.memory_space<vmem>>, vector<8x42xf32>,
    %42 = vector.extract_strided_slice %37 {offsets = [0, 3], sizes = [8, 42], strides = [1, 1]} : vector<8x84xf32> to vector<8x42xf32>
    %c16_23 = arith.constant 16 : index
    %c0_24 = arith.constant 0 : index
    %43 = vector.load %arg4[%c16_23, %c0_24] : memref<56x42xf32, #tpu.memory_space<vmem>>, vector<8x42xf32>
    tpu.vector_store %arg4[%c16_23, %c0_24], %42 {strides = array<i32>} : memref<56x42xf32, #tpu.memory_space<vmem>>, vector<8x42xf32>,
    %44 = vector.extract_strided_slice %37 {offsets = [0, 41], sizes = [8, 42], strides = [1, 1]} : vector<8x84xf32> to vector<8x42xf32>
    %c24 = arith.constant 24 : index
    %c0_25 = arith.constant 0 : index
    %45 = vector.load %arg4[%c24, %c0_25] : memref<56x42xf32, #tpu.memory_space<vmem>>, vector<8x42xf32>
    tpu.vector_store %arg4[%c24, %c0_25], %44 {strides = array<i32>} : memref<56x42xf32, #tpu.memory_space<vmem>>, vector<8x42xf32>,
    %46 = vector.extract_strided_slice %37 {offsets = [0, 40], sizes = [8, 42], strides = [1, 1]} : vector<8x84xf32> to vector<8x42xf32>
    %c32 = arith.constant 32 : index
    %c0_26 = arith.constant 0 : index
    %47 = vector.load %arg4[%c32, %c0_26] : memref<56x42xf32, #tpu.memory_space<vmem>>, vector<8x42xf32>
    tpu.vector_store %arg4[%c32, %c0_26], %46 {strides = array<i32>} : memref<56x42xf32, #tpu.memory_space<vmem>>, vector<8x42xf32>,
    %48 = vector.extract_strided_slice %37 {offsets = [0, 39], sizes = [8, 42], strides = [1, 1]} : vector<8x84xf32> to vector<8x42xf32>
    %c40 = arith.constant 40 : index
    %c0_27 = arith.constant 0 : index
    %49 = vector.load %arg4[%c40, %c0_27] : memref<56x42xf32, #tpu.memory_space<vmem>>, vector<8x42xf32>
    tpu.vector_store %arg4[%c40, %c0_27], %48 {strides = array<i32>} : memref<56x42xf32, #tpu.memory_space<vmem>>, vector<8x42xf32>,
    %50 = vector.extract_strided_slice %37 {offsets = [0, 0], sizes = [8, 42], strides = [1, 1]} : vector<8x84xf32> to vector<8x42xf32>
    %c48 = arith.constant 48 : index
    %c0_28 = arith.constant 0 : index
    %51 = vector.load %arg4[%c48, %c0_28] : memref<56x42xf32, #tpu.memory_space<vmem>>, vector<8x42xf32>
    tpu.vector_store %arg4[%c48, %c0_28], %50 {strides = array<i32>} : memref<56x42xf32, #tpu.memory_space<vmem>>, vector<8x42xf32>,
    %c0_29 = arith.constant 0 : index
    %c0_30 = arith.constant 0 : index
    %52 = vector.load %arg4[%c0_29, %c0_30] : memref<56x42xf32, #tpu.memory_space<vmem>>, vector<56x42xf32>
    %cst_31 = arith.constant dense<0.000000e+00> : vector<8x42xf32>
    %53 = tpu.matmul %9, %52, %cst_31 {dimension_numbers = #tpu.dot_dimension_numbers<[1], [0], [0], [1], [0, 0, 1, 1], [], []>} : vector<8x56xf32>, vector<56x42xf32>, vector<8x42xf32> -> vector<8x42xf32>
    %54 = vector.broadcast %8 : vector<8x1xf32> to vector<8x42xf32>
    %55 = arith.addf %53, %54 : vector<8x42xf32>
    %c0_32 = arith.constant 0 : index
    %c66 = arith.constant 66 : index
    %56 = vector.load %arg1[%c0_32, %c66] : memref<40x128xf32, #tpu.memory_space<vmem>>, vector<8x1xf32>
    %c0_33 = arith.constant 0 : index
    %c67 = arith.constant 67 : index
    %57 = vector.load %arg1[%c0_33, %c67] : memref<40x128xf32, #tpu.memory_space<vmem>>, vector<8x1xf32>
    %c0_34 = arith.constant 0 : index
    %c71 = arith.constant 71 : index
    %58 = vector.load %arg1[%c0_34, %c71] : memref<40x128xf32, #tpu.memory_space<vmem>>, vector<8x1xf32>
    %c24_35 = arith.constant 24 : index
    %c0_36 = arith.constant 0 : index
    %59 = vector.load %arg1[%c24_35, %c0_36] : memref<40x128xf32, #tpu.memory_space<vmem>>, vector<8x56xf32>
    %cst_37 = arith.constant dense<0.000000e+00> : vector<8xf32>
    %60 = vector.multi_reduction <add>, %55, %cst_37 [1] : vector<8x42xf32> to vector<8xf32>
    %61 = vector.shape_cast %60 : vector<8xf32> to vector<8x1xf32>
    %cst_38 = arith.constant 4.200000e+01 : f32
    %62 = vector.broadcast %cst_38 : f32 to vector<8x1xf32>
    %63 = arith.divf %61, %62 : vector<8x1xf32>
    %64 = vector.broadcast %63 : vector<8x1xf32> to vector<8x42xf32>
    %65 = arith.subf %55, %64 : vector<8x42xf32>
    %66 = arith.mulf %65, %65 : vector<8x42xf32>
    %cst_39 = arith.constant dense<0.000000e+00> : vector<8xf32>
    %67 = vector.multi_reduction <add>, %66, %cst_39 [1] : vector<8x42xf32> to vector<8xf32>
    %68 = vector.shape_cast %67 : vector<8xf32> to vector<8x1xf32>
    %cst_40 = arith.constant 4.200000e+01 : f32
    %69 = vector.broadcast %cst_40 : f32 to vector<8x1xf32>
    %70 = arith.divf %68, %69 : vector<8x1xf32>
    %cst_41 = arith.constant 9.99999974E-6 : f32
    %71 = vector.broadcast %cst_41 : f32 to vector<8x1xf32>
    %72 = arith.addf %70, %71 : vector<8x1xf32>
    %73 = math.rsqrt %72 : vector<8x1xf32>
    %74 = vector.broadcast %73 : vector<8x1xf32> to vector<8x42xf32>
    %75 = arith.mulf %65, %74 : vector<8x42xf32>
    %76 = vector.broadcast %56 : vector<8x1xf32> to vector<8x42xf32>
    %77 = arith.mulf %75, %76 : vector<8x42xf32>
    %78 = vector.broadcast %57 : vector<8x1xf32> to vector<8x42xf32>
    %79 = arith.addf %77, %78 : vector<8x42xf32>
    %cst_42 = arith.constant 0.000000e+00 : f32
    %80 = vector.broadcast %cst_42 : f32 to vector<8x42xf32>
    %81 = arith.cmpf oge, %79, %80 : vector<8x42xf32>
    %cst_43 = arith.constant 2.000000e-01 : f32
    %82 = vector.broadcast %cst_43 : f32 to vector<8x42xf32>
    %83 = arith.mulf %82, %79 : vector<8x42xf32>
    %84 = arith.select %81, %79, %83 : vector<8x42xi1>, vector<8x42xf32>
    %c0_44 = arith.constant 0 : index
    %c0_45 = arith.constant 0 : index
    %85 = vector.load %arg3[%c0_44, %c0_45] : memref<8x84xf32, #tpu.memory_space<vmem>>, vector<8x42xf32>
    tpu.vector_store %arg3[%c0_44, %c0_45], %84 {strides = array<i32>} : memref<8x84xf32, #tpu.memory_space<vmem>>, vector<8x42xf32>,
    %c0_46 = arith.constant 0 : index
    %c42_47 = arith.constant 42 : index
    %86 = vector.load %arg3[%c0_46, %c42_47] : memref<8x84xf32, #tpu.memory_space<vmem>>, vector<8x42xf32>
    tpu.vector_store %arg3[%c0_46, %c42_47], %84 {strides = array<i32>} : memref<8x84xf32, #tpu.memory_space<vmem>>, vector<8x42xf32>,
    %c0_48 = arith.constant 0 : index
    %c0_49 = arith.constant 0 : index
    %87 = vector.load %arg3[%c0_48, %c0_49] : memref<8x84xf32, #tpu.memory_space<vmem>>, vector<8x84xf32>
    %88 = vector.extract_strided_slice %87 {offsets = [0, 1], sizes = [8, 42], strides = [1, 1]} : vector<8x84xf32> to vector<8x42xf32>
    %c0_50 = arith.constant 0 : index
    %c0_51 = arith.constant 0 : index
    %89 = vector.load %arg4[%c0_50, %c0_51] : memref<56x42xf32, #tpu.memory_space<vmem>>, vector<8x42xf32>
    tpu.vector_store %arg4[%c0_50, %c0_51], %88 {strides = array<i32>} : memref<56x42xf32, #tpu.memory_space<vmem>>, vector<8x42xf32>,
    %90 = vector.extract_strided_slice %87 {offsets = [0, 2], sizes = [8, 42], strides = [1, 1]} : vector<8x84xf32> to vector<8x42xf32>
    %c8_52 = arith.constant 8 : index
    %c0_53 = arith.constant 0 : index
    %91 = vector.load %arg4[%c8_52, %c0_53] : memref<56x42xf32, #tpu.memory_space<vmem>>, vector<8x42xf32>
    tpu.vector_store %arg4[%c8_52, %c0_53], %90 {strides = array<i32>} : memref<56x42xf32, #tpu.memory_space<vmem>>, vector<8x42xf32>,
    %92 = vector.extract_strided_slice %87 {offsets = [0, 3], sizes = [8, 42], strides = [1, 1]} : vector<8x84xf32> to vector<8x42xf32>
    %c16_54 = arith.constant 16 : index
    %c0_55 = arith.constant 0 : index
    %93 = vector.load %arg4[%c16_54, %c0_55] : memref<56x42xf32, #tpu.memory_space<vmem>>, vector<8x42xf32>
    tpu.vector_store %arg4[%c16_54, %c0_55], %92 {strides = array<i32>} : memref<56x42xf32, #tpu.memory_space<vmem>>, vector<8x42xf32>,
    %94 = vector.extract_strided_slice %87 {offsets = [0, 41], sizes = [8, 42], strides = [1, 1]} : vector<8x84xf32> to vector<8x42xf32>
    %c24_56 = arith.constant 24 : index
    %c0_57 = arith.constant 0 : index
    %95 = vector.load %arg4[%c24_56, %c0_57] : memref<56x42xf32, #tpu.memory_space<vmem>>, vector<8x42xf32>
    tpu.vector_store %arg4[%c24_56, %c0_57], %94 {strides = array<i32>} : memref<56x42xf32, #tpu.memory_space<vmem>>, vector<8x42xf32>,
    %96 = vector.extract_strided_slice %87 {offsets = [0, 40], sizes = [8, 42], strides = [1, 1]} : vector<8x84xf32> to vector<8x42xf32>
    %c32_58 = arith.constant 32 : index
    %c0_59 = arith.constant 0 : index
    %97 = vector.load %arg4[%c32_58, %c0_59] : memref<56x42xf32, #tpu.memory_space<vmem>>, vector<8x42xf32>
    tpu.vector_store %arg4[%c32_58, %c0_59], %96 {strides = array<i32>} : memref<56x42xf32, #tpu.memory_space<vmem>>, vector<8x42xf32>,
    %98 = vector.extract_strided_slice %87 {offsets = [0, 39], sizes = [8, 42], strides = [1, 1]} : vector<8x84xf32> to vector<8x42xf32>
    %c40_60 = arith.constant 40 : index
    %c0_61 = arith.constant 0 : index
    %99 = vector.load %arg4[%c40_60, %c0_61] : memref<56x42xf32, #tpu.memory_space<vmem>>, vector<8x42xf32>
    tpu.vector_store %arg4[%c40_60, %c0_61], %98 {strides = array<i32>} : memref<56x42xf32, #tpu.memory_space<vmem>>, vector<8x42xf32>,
    %100 = vector.extract_strided_slice %87 {offsets = [0, 0], sizes = [8, 42], strides = [1, 1]} : vector<8x84xf32> to vector<8x42xf32>
    %c48_62 = arith.constant 48 : index
    %c0_63 = arith.constant 0 : index
    %101 = vector.load %arg4[%c48_62, %c0_63] : memref<56x42xf32, #tpu.memory_space<vmem>>, vector<8x42xf32>
    tpu.vector_store %arg4[%c48_62, %c0_63], %100 {strides = array<i32>} : memref<56x42xf32, #tpu.memory_space<vmem>>, vector<8x42xf32>,
    %c0_64 = arith.constant 0 : index
    %c0_65 = arith.constant 0 : index
    %102 = vector.load %arg4[%c0_64, %c0_65] : memref<56x42xf32, #tpu.memory_space<vmem>>, vector<56x42xf32>
    %cst_66 = arith.constant dense<0.000000e+00> : vector<8x42xf32>
    %103 = tpu.matmul %59, %102, %cst_66 {dimension_numbers = #tpu.dot_dimension_numbers<[1], [0], [0], [1], [0, 0, 1, 1], [], []>} : vector<8x56xf32>, vector<56x42xf32>, vector<8x42xf32> -> vector<8x42xf32>
    %104 = vector.broadcast %58 : vector<8x1xf32> to vector<8x42xf32>
    %105 = arith.addf %103, %104 : vector<8x42xf32>
    %c0_67 = arith.constant 0 : index
    %c68 = arith.constant 68 : index
    %106 = vector.load %arg1[%c0_67, %c68] : memref<40x128xf32, #tpu.memory_space<vmem>>, vector<8x1xf32>
    %c0_68 = arith.constant 0 : index
    %c69 = arith.constant 69 : index
    %107 = vector.load %arg1[%c0_68, %c69] : memref<40x128xf32, #tpu.memory_space<vmem>>, vector<8x1xf32>
    %c0_69 = arith.constant 0 : index
    %c72 = arith.constant 72 : index
    %108 = vector.load %arg1[%c0_69, %c72] : memref<40x128xf32, #tpu.memory_space<vmem>>, vector<2x1xf32>
    %c32_70 = arith.constant 32 : index
    %c0_71 = arith.constant 0 : index
    %109 = vector.load %arg1[%c32_70, %c0_71] : memref<40x128xf32, #tpu.memory_space<vmem>>, vector<2x56xf32>
    %cst_72 = arith.constant dense<0.000000e+00> : vector<8xf32>
    %110 = vector.multi_reduction <add>, %105, %cst_72 [1] : vector<8x42xf32> to vector<8xf32>
    %111 = vector.shape_cast %110 : vector<8xf32> to vector<8x1xf32>
    %cst_73 = arith.constant 4.200000e+01 : f32
    %112 = vector.broadcast %cst_73 : f32 to vector<8x1xf32>
    %113 = arith.divf %111, %112 : vector<8x1xf32>
    %114 = vector.broadcast %113 : vector<8x1xf32> to vector<8x42xf32>
    %115 = arith.subf %105, %114 : vector<8x42xf32>
    %116 = arith.mulf %115, %115 : vector<8x42xf32>
    %cst_74 = arith.constant dense<0.000000e+00> : vector<8xf32>
    %117 = vector.multi_reduction <add>, %116, %cst_74 [1] : vector<8x42xf32> to vector<8xf32>
    %118 = vector.shape_cast %117 : vector<8xf32> to vector<8x1xf32>
    %cst_75 = arith.constant 4.200000e+01 : f32
    %119 = vector.broadcast %cst_75 : f32 to vector<8x1xf32>
    %120 = arith.divf %118, %119 : vector<8x1xf32>
    %cst_76 = arith.constant 9.99999974E-6 : f32
    %121 = vector.broadcast %cst_76 : f32 to vector<8x1xf32>
    %122 = arith.addf %120, %121 : vector<8x1xf32>
    %123 = math.rsqrt %122 : vector<8x1xf32>
    %124 = vector.broadcast %123 : vector<8x1xf32> to vector<8x42xf32>
    %125 = arith.mulf %115, %124 : vector<8x42xf32>
    %126 = vector.broadcast %106 : vector<8x1xf32> to vector<8x42xf32>
    %127 = arith.mulf %125, %126 : vector<8x42xf32>
    %128 = vector.broadcast %107 : vector<8x1xf32> to vector<8x42xf32>
    %129 = arith.addf %127, %128 : vector<8x42xf32>
    %cst_77 = arith.constant 0.000000e+00 : f32
    %130 = vector.broadcast %cst_77 : f32 to vector<8x42xf32>
    %131 = arith.cmpf oge, %129, %130 : vector<8x42xf32>
    %cst_78 = arith.constant 2.000000e-01 : f32
    %132 = vector.broadcast %cst_78 : f32 to vector<8x42xf32>
    %133 = arith.mulf %132, %129 : vector<8x42xf32>
    %134 = arith.select %131, %129, %133 : vector<8x42xi1>, vector<8x42xf32>
    %c0_79 = arith.constant 0 : index
    %c0_80 = arith.constant 0 : index
    %135 = vector.load %arg3[%c0_79, %c0_80] : memref<8x84xf32, #tpu.memory_space<vmem>>, vector<8x42xf32>
    tpu.vector_store %arg3[%c0_79, %c0_80], %134 {strides = array<i32>} : memref<8x84xf32, #tpu.memory_space<vmem>>, vector<8x42xf32>,
    %c0_81 = arith.constant 0 : index
    %c42_82 = arith.constant 42 : index
    %136 = vector.load %arg3[%c0_81, %c42_82] : memref<8x84xf32, #tpu.memory_space<vmem>>, vector<8x42xf32>
    tpu.vector_store %arg3[%c0_81, %c42_82], %134 {strides = array<i32>} : memref<8x84xf32, #tpu.memory_space<vmem>>, vector<8x42xf32>,
    %c0_83 = arith.constant 0 : index
    %c0_84 = arith.constant 0 : index
    %137 = vector.load %arg3[%c0_83, %c0_84] : memref<8x84xf32, #tpu.memory_space<vmem>>, vector<8x84xf32>
    %138 = vector.extract_strided_slice %137 {offsets = [0, 1], sizes = [8, 42], strides = [1, 1]} : vector<8x84xf32> to vector<8x42xf32>
    %c0_85 = arith.constant 0 : index
    %c0_86 = arith.constant 0 : index
    %139 = vector.load %arg4[%c0_85, %c0_86] : memref<56x42xf32, #tpu.memory_space<vmem>>, vector<8x42xf32>
    tpu.vector_store %arg4[%c0_85, %c0_86], %138 {strides = array<i32>} : memref<56x42xf32, #tpu.memory_space<vmem>>, vector<8x42xf32>,
    %140 = vector.extract_strided_slice %137 {offsets = [0, 2], sizes = [8, 42], strides = [1, 1]} : vector<8x84xf32> to vector<8x42xf32>
    %c8_87 = arith.constant 8 : index
    %c0_88 = arith.constant 0 : index
    %141 = vector.load %arg4[%c8_87, %c0_88] : memref<56x42xf32, #tpu.memory_space<vmem>>, vector<8x42xf32>
    tpu.vector_store %arg4[%c8_87, %c0_88], %140 {strides = array<i32>} : memref<56x42xf32, #tpu.memory_space<vmem>>, vector<8x42xf32>,
    %142 = vector.extract_strided_slice %137 {offsets = [0, 3], sizes = [8, 42], strides = [1, 1]} : vector<8x84xf32> to vector<8x42xf32>
    %c16_89 = arith.constant 16 : index
    %c0_90 = arith.constant 0 : index
    %143 = vector.load %arg4[%c16_89, %c0_90] : memref<56x42xf32, #tpu.memory_space<vmem>>, vector<8x42xf32>
    tpu.vector_store %arg4[%c16_89, %c0_90], %142 {strides = array<i32>} : memref<56x42xf32, #tpu.memory_space<vmem>>, vector<8x42xf32>,
    %144 = vector.extract_strided_slice %137 {offsets = [0, 41], sizes = [8, 42], strides = [1, 1]} : vector<8x84xf32> to vector<8x42xf32>
    %c24_91 = arith.constant 24 : index
    %c0_92 = arith.constant 0 : index
    %145 = vector.load %arg4[%c24_91, %c0_92] : memref<56x42xf32, #tpu.memory_space<vmem>>, vector<8x42xf32>
    tpu.vector_store %arg4[%c24_91, %c0_92], %144 {strides = array<i32>} : memref<56x42xf32, #tpu.memory_space<vmem>>, vector<8x42xf32>,
    %146 = vector.extract_strided_slice %137 {offsets = [0, 40], sizes = [8, 42], strides = [1, 1]} : vector<8x84xf32> to vector<8x42xf32>
    %c32_93 = arith.constant 32 : index
    %c0_94 = arith.constant 0 : index
    %147 = vector.load %arg4[%c32_93, %c0_94] : memref<56x42xf32, #tpu.memory_space<vmem>>, vector<8x42xf32>
    tpu.vector_store %arg4[%c32_93, %c0_94], %146 {strides = array<i32>} : memref<56x42xf32, #tpu.memory_space<vmem>>, vector<8x42xf32>,
    %148 = vector.extract_strided_slice %137 {offsets = [0, 39], sizes = [8, 42], strides = [1, 1]} : vector<8x84xf32> to vector<8x42xf32>
    %c40_95 = arith.constant 40 : index
    %c0_96 = arith.constant 0 : index
    %149 = vector.load %arg4[%c40_95, %c0_96] : memref<56x42xf32, #tpu.memory_space<vmem>>, vector<8x42xf32>
    tpu.vector_store %arg4[%c40_95, %c0_96], %148 {strides = array<i32>} : memref<56x42xf32, #tpu.memory_space<vmem>>, vector<8x42xf32>,
    %150 = vector.extract_strided_slice %137 {offsets = [0, 0], sizes = [8, 42], strides = [1, 1]} : vector<8x84xf32> to vector<8x42xf32>
    %c48_97 = arith.constant 48 : index
    %c0_98 = arith.constant 0 : index
    %151 = vector.load %arg4[%c48_97, %c0_98] : memref<56x42xf32, #tpu.memory_space<vmem>>, vector<8x42xf32>
    tpu.vector_store %arg4[%c48_97, %c0_98], %150 {strides = array<i32>} : memref<56x42xf32, #tpu.memory_space<vmem>>, vector<8x42xf32>,
    %c0_99 = arith.constant 0 : index
    %c0_100 = arith.constant 0 : index
    %152 = vector.load %arg4[%c0_99, %c0_100] : memref<56x42xf32, #tpu.memory_space<vmem>>, vector<56x42xf32>
    %cst_101 = arith.constant dense<0.000000e+00> : vector<2x42xf32>
    %153 = tpu.matmul %109, %152, %cst_101 {dimension_numbers = #tpu.dot_dimension_numbers<[1], [0], [0], [1], [0, 0, 1, 1], [], []>} : vector<2x56xf32>, vector<56x42xf32>, vector<2x42xf32> -> vector<2x42xf32>
    %154 = vector.broadcast %108 : vector<2x1xf32> to vector<2x42xf32>
    %155 = arith.addf %153, %154 : vector<2x42xf32>
    %c0_102 = arith.constant 0 : index
    %c0_103 = arith.constant 0 : index
    %156 = vector.load %arg2[%c0_102, %c0_103] : memref<2x42xf32, #tpu.memory_space<vmem>>, vector<2x42xf32>
    tpu.vector_store %arg2[%c0_102, %c0_103], %155 {strides = array<i32>} : memref<2x42xf32, #tpu.memory_space<vmem>>, vector<2x42xf32>,
    return
  }
}

</mosaic_0001>

<bundles_post_ra>
// kernel: gen_age_net_forward.1
= control target key start
LH: loop header
LB: loop body
LE: loop exit
PB: predicated region body
PF: predicated region fallthrough
CT: control target
= control target key end

     0   :  { %8 = vsyncpa [#allocation6], 0  ;;  %s594_s0 = inlined_call_operand.<no memory space> [shape: f32[1,1], index: 0, kind: input, shape index: {}]   ;;  %s595_s1 = inlined_call_operand.hbm [shape: f32[40,128], index: 1, kind: input, shape index: {}]   ;;  %s596_s2 = inlined_call_operand.hbm [shape: f32[2,42], index: 2, kind: output, shape index: {}]  }
   0x1   :  { %9 = vsyncpa [#allocation7], 0  ;;  %s16_s11 = sshll.u32 %s595_s1, 4  ;;  %s473_s12 = smov [#allocation5]   ;;  %s17_s11 = int_to_ptr.hbm [resolvable:$true] %s16_s11 }
   0x2   :  { %s18_s13 = sshll.u32 %s473_s12, 4  ;;  %s474_s14 = smov 128   ;;  %s19_s13 = int_to_ptr.vmem [resolvable:$true] %s18_s13 }
   0x3   :  { %s475_s15 = smov 8  }
   0x4   :  { %24 = dma.hbm_to_vmem [thread:$0]  %s17_s11, 640, %s19_s13, [#allocation6], %s474_s14, %s474_s14, %s475_s15  }
   0x5   :  { %469 = dma.done.wait [#allocation6], 640  }
   0x6   :  { %470 = vsyncadd [#allocation6], 4294966656  ;;  %v31_v0 = vstv %s594_s0  ;;  %v515_v1 = vld [vmem:[#allocation5] sm:$0xff]  ;;  %v33_v2 = vld [vmem:[#allocation5 + $0x8] sm:$0xff]  ;;  %vm36_vm0 = vcmask 343040   ;;  %v476_v6 = vmov 42.0  }
   0x7   :  { %v32_v3 = vmul.f32 %v31_v0, %v515_v1  ;;  %413 = vrcp.f32 %v476_v6  ;;  %v477_v7 = vmov 64   ;;  %v478_v11 = vmov 65   ;;  %s479_s0 = smov 42   ;;  %s480_s1 = smov 87   ;;  %v35_v52 = vld [vmem:[#allocation5 + $0x10] sm:$0xff] }
   0x8   :  { %404 = vset.pattern.permute.xlu1 %v477_v7  ;;  %vm85_vm6 = vcmask 687440   ;;  %s481_s18 = smov 88   ;;  %s482_s19 = smov 89   ;;  %v486_v43 = vmov 70   ;;  %vm125_vm7 = vcmask 457728   ;;  %v487_v58 = vmov 66  }
   0x9   :  { %v34_v4 = vadd.f32 %v33_v2, %v32_v3  ;;  %68 = vperm.xlu1 %404, %v515_v1   ;;  %s483_s20 = smov 126   ;;  %s484_s21 = smov 125   ;;  %v488_v59 = vmov 67  }
   0xa   :  { %s485_s22 = smov 127   ;;  %s493_s23 = smov [#allocation8]  }
   0xb   :  { %v37_v5 = vsel %vm36_vm0, %v34_v4, 0.0  ;;  %s368_s24 = sshll.u32 %s493_s23, 4  ;;  %s370_s27 = sshll.u32 %s596_s2, 4  ;;  %s369_s24 = int_to_ptr.vmem [resolvable:$true] %s368_s24  ;;  %s371_s27 = int_to_ptr.hbm [resolvable:$true] %s370_s27 }
   0xc   :  { %38 = vadd.xlane.f32.xlu0 %v37_v5 }
   0xd   :  { %v414_v8 = vpop.eup %413 }
   0xe   :  { %v41_v9 = vmul.f32 42.0, %v414_v8  ;;  %vm45_vm1 = vweird.f32 %v414_v8 }
  0x10   :  { %v42_v10 = vsub.f32 1.0, %v41_v9 }
  0x11   :  { %405 = vset.pattern.permute.xlu1 %v478_v11 }
  0x12   :  { %73 = vperm.xlu1 %405, %v515_v1   ;;  %v43_v12 = vmul.f32 %v414_v8, %v42_v10 }
  0x14   :  { %v44_v13 = vadd.f32 %v414_v8, %v43_v12 }
  0x16   :  { %v521_v14 = vsel %vm45_vm1, %v414_v8, %v44_v13  ;;  %vm361_vm1 = vcmask 336896  }
  0x1a   :  { %406 = vset.pattern.permute.xlu1 %v486_v43 }
  0x7b   :  { %v69_v26 = vpop.permute.xlu1 %68 }
  0x7f   :  { %v39_v15 = vpop.xlane.xlu0 %38 }
  0x80   :  { %v47_v16 = vmul.f32 %v521_v14, %v39_v15 }
  0x82   :  { %v48_v17 = vsub.f32 %v34_v4, %v47_v16 }
  0x84   :  { %v49_v18 = vmul.f32 %v48_v17, %v48_v17  ;;  %v74_v32 = vpop.permute.xlu1 %73 }
  0x86   :  { %v50_v19 = vsel %vm36_vm0, %v49_v18, 0.0 }
  0x87   :  { %51 = vadd.xlane.f32.xlu0 %v50_v19 }
  0xfa   :  { %v52_v20 = vpop.xlane.xlu0 %51 }
  0xfb   :  { %v53_v21 = vmul.f32 %v52_v20, %v521_v14 }
  0xfd   :  { %v54_v22 = vadd.f32 1e-05, %v53_v21 }
  0xff   :  { %415 = vrsqrt.f32 %v54_v22  ;;  %vm61_vm3 = vweird.f32 %v54_v22 }
 0x105   :  { %v416_v23 = vpop.eup %415 }
 0x106   :  { %v56_v24 = vmul.f32 %v416_v23, %v54_v22  ;;  %vm62_vm2 = vweird.f32 %v416_v23 }
 0x107   :  { %vm63_vm4 = vmor %vm61_vm3, %vm62_vm2 }
 0x108   :  { %v57_v25 = vmul.f32 %v416_v23, %v56_v24 }
 0x10a   :  { %v58_v27 = vmul.f32 0.5, %v57_v25 }
 0x10c   :  { %v59_v28 = vsub.f32 1.5, %v58_v27 }
 0x10e   :  { %v60_v29 = vmul.f32 %v416_v23, %v59_v28 }
 0x110   :  { %v64_v30 = vsel %vm63_vm4, %v416_v23, %v60_v29 }
 0x111   :  { %v65_v31 = vmul.f32 %v64_v30, %v48_v17 }
 0x113   :  { %v71_v33 = vmul.f32 %v69_v26, %v65_v31  ;;  %v489_v26 = vmov 71  }
 0x115   :  { %v76_v34 = vadd.f32 %v74_v32, %v71_v33 }
 0x117   :  { %vm77_vm5 = vcmp.ge.f32.partialorder %v76_v34, 0.0  ;;  %v78_v35 = vmul.f32 0.2, %v76_v34 }
 0x119   :  { %v79_v36 = vsel %vm77_vm5, %v76_v34, %v78_v35  ;;  %v150_v35 = vld [vmem:[#allocation5 + $0x18] sm:$0xff] }
 0x11a   :  { %82 = vrot.lane.b32.xlu2 %v79_v36, %s479_s0  ;;  %80 = vst.msk [vmem:[#allocation2] sm:$0xff] %vm36_vm0, %v79_v36 }
 0x174   :  { %v83_v37 = vpop.permute.xlu2 %82 }
 0x175   :  { %86 = vst.msk [vmem:[#allocation2] sm:$0xff] %vm85_vm6, %v83_v37 }
 0x17c   :  { %v87_v38 = vld [vmem:[#allocation2] sm:$0xff] }
 0x17d   :  { %101 = vrot.lane.b32.xlu1 %v87_v38, %s480_s1  ;;  %113 = vst.msk [vmem:[#allocation3 + $0x30] sm:$0xff] %vm36_vm0, %v87_v38  ;;  %105 = vrot.lane.b32.xlu0 %v87_v38, %s481_s18 }
 0x17e   :  { %109 = vrot.lane.b32.xlu2 %v87_v38, %s482_s19 }
 0x184   :  { %v120_v39 = vld [vmem:[#allocation3 + $0x30] sm:$0xff] }
 0x185   :  { %93 = vrot.lane.b32.xlu1 %v87_v38, %s483_s20  ;;  %138 = vmatpush.msra.mxu0 %v120_v39 }
 0x186   :  { %97 = vrot.lane.b32.xlu2 %v87_v38, %s484_s21 }
 0x18d   :  { %122 = vperm.xlu1 %406, %v515_v1  }
 0x18e   :  { %89 = vrot.lane.b32.xlu2 %v87_v38, %s485_s22 }
 0x195   :  { %407 = vset.pattern.permute.xlu1 %v487_v58 }
 0x196   :  { %175 = vperm.xlu1 %407, %v515_v1  }
 0x19e   :  { %408 = vset.pattern.permute.xlu1 %v488_v59 }
 0x19f   :  { %180 = vperm.xlu1 %408, %v515_v1  }
 0x1a7   :  { %409 = vset.pattern.permute.xlu1 %v489_v26 }
 0x1d8   :  { %v110_v40 = vpop.permute.xlu2 %109 }
 0x1d9   :  { %112 = vst.msk [vmem:[#allocation3 + $0x28] sm:$0xff] %vm36_vm0, %v110_v40 }
 0x1e0   :  { %v98_v41 = vpop.permute.xlu2 %97  ;;  %v119_v42 = vld [vmem:[#allocation3 + $0x28] sm:$0xff] }
 0x1e1   :  { %100 = vst.msk [vmem:[#allocation3 + $0x10] sm:$0xff] %vm36_vm0, %v98_v41  ;;  %139 = vmatpush.msra.mxu0 %v119_v42  ;;  %v490_v41 = vmov 68   ;;  %v491_v42 = vmov 69  }
 0x1e8   :  { %v90_v44 = vpop.permute.xlu2 %89  ;;  %v116_v50 = vld [vmem:[#allocation3 + $0x10] sm:$0xff] }
 0x1e9   :  { %92 = vst.msk [vmem:[#allocation3] sm:$0xff] %vm36_vm0, %v90_v44 }
 0x1ef   :  { %v102_v45 = vpop.permute.xlu1 %101  ;;  %v106_v46 = vpop.permute.xlu0 %105 }
 0x1f0   :  { %104 = vst.msk [vmem:[#allocation3 + $0x18] sm:$0xff] %vm36_vm0, %v102_v45  ;;  %v114_v53 = vld [vmem:[#allocation3] sm:$0xff] }
 0x1f1   :  { %108 = vst.msk [vmem:[#allocation3 + $0x20] sm:$0xff] %vm36_vm0, %v106_v46 }
 0x1f7   :  { %v94_v47 = vpop.permute.xlu1 %93  ;;  %v117_v49 = vld [vmem:[#allocation3 + $0x18] sm:$0xff] }
 0x1f8   :  { %96 = vst.msk [vmem:[#allocation3 + $0x8] sm:$0xff] %vm36_vm0, %v94_v47  ;;  %v118_v48 = vld [vmem:[#allocation3 + $0x20] sm:$0xff] }
 0x1f9   :  { %140 = vmatpush.msra.mxu0 %v118_v48 }
 0x1fb   :  { %141 = vmatpush.msra.mxu0 %v117_v49 }
 0x1fd   :  { %142 = vmatpush.msra.mxu0 %v116_v50 }
 0x1ff   :  { %v115_v51 = vld [vmem:[#allocation3 + $0x8] sm:$0xff]  ;;  %v123_v54 = vpop.permute.xlu1 %122 }
 0x200   :  { %143 = vmatpush.msra.mxu0 %v115_v51 }
 0x202   :  { %144 = vmatpush.msra.mxu0 %v114_v53 }
 0x203   :  { %380 = vmatmul.msk.f32.vlgmr.msra.gmra.mxu0 %vm125_vm7, %v35_v52 }
 0x208   :  { %v176_v8 = vpop.permute.xlu1 %175 }
 0x211   :  { %v181_v15 = vpop.permute.xlu1 %180 }
 0x280   :  { %v146_v55 = vpop.f32.mrf.mxu0 }
 0x281   :  { %v147_v56 = vadd.f32 %v146_v55, %v123_v54 }
 0x283   :  { %v151_v57 = vsel %vm36_vm0, %v147_v56, 0.0 }
 0x284   :  { %152 = vadd.xlane.f32.xlu2 %v151_v57 }
 0x2f7   :  { %v153_v60 = vpop.xlane.xlu2 %152 }
 0x2f8   :  { %v154_v61 = vmul.f32 %v153_v60, %v521_v14 }
 0x2fa   :  { %v155_v62 = vsub.f32 %v147_v56, %v154_v61 }
 0x2fc   :  { %v156_v63 = vmul.f32 %v155_v62, %v155_v62 }
 0x2fe   :  { %v157_v0 = vsel %vm36_vm0, %v156_v63, 0.0 }
 0x2ff   :  { %158 = vadd.xlane.f32.xlu0 %v157_v0 }
 0x372   :  { %v159_v2 = vpop.xlane.xlu0 %158 }
 0x373   :  { %v160_v3 = vmul.f32 %v159_v2, %v521_v14 }
 0x375   :  { %v161_v4 = vadd.f32 1e-05, %v160_v3 }
 0x377   :  { %417 = vrsqrt.f32 %v161_v4  ;;  %vm168_vm9 = vweird.f32 %v161_v4 }
 0x37d   :  { %v418_v5 = vpop.eup %417 }
 0x37e   :  { %v163_v6 = vmul.f32 %v418_v5, %v161_v4  ;;  %vm169_vm8 = vweird.f32 %v418_v5 }
 0x37f   :  { %vm170_vm10 = vmor %vm168_vm9, %vm169_vm8 }
 0x380   :  { %v164_v7 = vmul.f32 %v418_v5, %v163_v6  ;;  %v255_v6 = vld [vmem:[#allocation5] sm:$0x3] }
 0x382   :  { %v165_v9 = vmul.f32 0.5, %v164_v7  ;;  %v492_v7 = vmov 72  }
 0x383   :  { %412 = vset.pattern.permute.xlu0 %v492_v7 }
 0x384   :  { %v166_v10 = vsub.f32 1.5, %v165_v9 }
 0x386   :  { %v167_v11 = vmul.f32 %v418_v5, %v166_v10 }
 0x388   :  { %v171_v12 = vsel %vm170_vm10, %v418_v5, %v167_v11 }
 0x389   :  { %v172_v13 = vmul.f32 %v171_v12, %v155_v62 }
 0x38b   :  { %v178_v16 = vmul.f32 %v176_v8, %v172_v13 }
 0x38d   :  { %v183_v17 = vadd.f32 %v181_v15, %v178_v16 }
 0x38f   :  { %v185_v18 = vmul.f32 0.2, %v183_v17  ;;  %vm184_vm11 = vcmp.ge.f32.partialorder %v183_v17, 0.0 }
 0x391   :  { %v186_v19 = vsel %vm184_vm11, %v183_v17, %v185_v18  ;;  %v256_v17 = vld [vmem:[#allocation5 + $0x20] sm:$0x3] }
 0x392   :  { %189 = vrot.lane.b32.xlu1 %v186_v19, %s479_s0  ;;  %187 = vst.msk [vmem:[#allocation2] sm:$0xff] %vm36_vm0, %v186_v19 }
 0x404   :  { %v190_v20 = vpop.permute.xlu1 %189 }
 0x405   :  { %192 = vst.msk [vmem:[#allocation2] sm:$0xff] %vm85_vm6, %v190_v20 }
 0x40c   :  { %v193_v21 = vld [vmem:[#allocation2] sm:$0xff] }
 0x40d   :  { %203 = vrot.lane.b32.xlu0 %v193_v21, %s484_s21  ;;  %219 = vst.msk [vmem:[#allocation3 + $0x30] sm:$0xff] %vm36_vm0, %v193_v21  ;;  %207 = vrot.lane.b32.xlu2 %v193_v21, %s480_s1 }
 0x40e   :  { %215 = vrot.lane.b32.xlu1 %v193_v21, %s482_s19 }
 0x414   :  { %v226_v22 = vld [vmem:[#allocation3 + $0x30] sm:$0xff] }
 0x415   :  { %243 = vmatpush.msra.mxu1 %v226_v22 }
 0x416   :  { %211 = vrot.lane.b32.xlu1 %v193_v21, %s481_s18 }
 0x41e   :  { %199 = vrot.lane.b32.xlu1 %v193_v21, %s483_s20 }
 0x426   :  { %195 = vrot.lane.b32.xlu1 %v193_v21, %s485_s22 }
 0x42e   :  { %228 = vperm.xlu1 %409, %v515_v1  }
 0x436   :  { %410 = vset.pattern.permute.xlu1 %v490_v41 }
 0x437   :  { %281 = vperm.xlu1 %410, %v515_v1  }
 0x43f   :  { %411 = vset.pattern.permute.xlu1 %v491_v42 }
 0x440   :  { %286 = vperm.xlu1 %411, %v515_v1  }
 0x467   :  { %v208_v23 = vpop.permute.xlu2 %207 }
 0x468   :  { %210 = vst.msk [vmem:[#allocation3 + $0x18] sm:$0xff] %vm36_vm0, %v208_v23 }
 0x46f   :  { %v223_v31 = vld [vmem:[#allocation3 + $0x18] sm:$0xff] }
 0x47f   :  { %v204_v24 = vpop.permute.xlu0 %203 }
 0x480   :  { %206 = vst.msk [vmem:[#allocation3 + $0x10] sm:$0xff] %vm36_vm0, %v204_v24  ;;  %v216_v25 = vpop.permute.xlu1 %215 }
 0x481   :  { %218 = vst.msk [vmem:[#allocation3 + $0x28] sm:$0xff] %vm36_vm0, %v216_v25 }
 0x487   :  { %v222_v32 = vld [vmem:[#allocation3 + $0x10] sm:$0xff] }
 0x488   :  { %v212_v27 = vpop.permute.xlu1 %211  ;;  %v225_v28 = vld [vmem:[#allocation3 + $0x28] sm:$0xff] }
 0x489   :  { %214 = vst.msk [vmem:[#allocation3 + $0x20] sm:$0xff] %vm36_vm0, %v212_v27  ;;  %244 = vmatpush.msra.mxu1 %v225_v28 }
 0x490   :  { %v200_v29 = vpop.permute.xlu1 %199  ;;  %v224_v30 = vld [vmem:[#allocation3 + $0x20] sm:$0xff] }
 0x491   :  { %202 = vst.msk [vmem:[#allocation3 + $0x8] sm:$0xff] %vm36_vm0, %v200_v29  ;;  %245 = vmatpush.msra.mxu1 %v224_v30 }
 0x493   :  { %246 = vmatpush.msra.mxu1 %v223_v31 }
 0x495   :  { %247 = vmatpush.msra.mxu1 %v222_v32 }
 0x498   :  { %v196_v33 = vpop.permute.xlu1 %195  ;;  %v221_v34 = vld [vmem:[#allocation3 + $0x8] sm:$0xff] }
 0x499   :  { %198 = vst.msk [vmem:[#allocation3] sm:$0xff] %vm36_vm0, %v196_v33  ;;  %248 = vmatpush.msra.mxu1 %v221_v34 }
 0x4a0   :  { %v220_v36 = vld [vmem:[#allocation3] sm:$0xff]  ;;  %v229_v37 = vpop.permute.xlu1 %228 }
 0x4a1   :  { %249 = vmatpush.msra.mxu1 %v220_v36 }
 0x4a2   :  { %381 = vmatmul.msk.f32.vlgmr.msra.gmra.mxu1 %vm125_vm7, %v150_v35 }
 0x4a9   :  { %v282_v54 = vpop.permute.xlu1 %281 }
 0x4b2   :  { %v287_v59 = vpop.permute.xlu1 %286 }
 0x51f   :  { %v251_v38 = vpop.f32.mrf.mxu1 }
 0x520   :  { %v252_v39 = vadd.f32 %v251_v38, %v229_v37 }
 0x522   :  { %v257_v40 = vsel %vm36_vm0, %v252_v39, 0.0 }
 0x523   :  { %258 = vadd.xlane.f32.xlu2 %v257_v40 }
 0x596   :  { %v259_v43 = vpop.xlane.xlu2 %258 }
 0x597   :  { %v260_v44 = vmul.f32 %v259_v43, %v521_v14 }
 0x599   :  { %v261_v45 = vsub.f32 %v252_v39, %v260_v44 }
 0x59b   :  { %v262_v46 = vmul.f32 %v261_v45, %v261_v45 }
 0x59d   :  { %v263_v47 = vsel %vm36_vm0, %v262_v46, 0.0 }
 0x59e   :  { %264 = vadd.xlane.f32.xlu0 %v263_v47 }
 0x611   :  { %v265_v48 = vpop.xlane.xlu0 %264 }
 0x612   :  { %v266_v49 = vmul.f32 %v265_v48, %v521_v14 }
 0x614   :  { %v267_v50 = vadd.f32 1e-05, %v266_v49 }
 0x616   :  { %419 = vrsqrt.f32 %v267_v50  ;;  %vm274_vm13 = vweird.f32 %v267_v50 }
 0x61c   :  { %v420_v51 = vpop.eup %419 }
 0x61d   :  { %v269_v52 = vmul.f32 %v420_v51, %v267_v50  ;;  %vm275_vm12 = vweird.f32 %v420_v51 }
 0x61e   :  { %vm276_vm14 = vmor %vm274_vm13, %vm275_vm12 }
 0x61f   :  { %v270_v53 = vmul.f32 %v420_v51, %v269_v52 }
 0x621   :  { %v271_v55 = vmul.f32 0.5, %v270_v53 }
 0x623   :  { %v272_v56 = vsub.f32 1.5, %v271_v55 }
 0x625   :  { %v273_v1 = vmul.f32 %v420_v51, %v272_v56 }
 0x627   :  { %v277_v57 = vsel %vm276_vm14, %v420_v51, %v273_v1 }
 0x628   :  { %v278_v58 = vmul.f32 %v277_v57, %v261_v45 }
 0x62a   :  { %v284_v60 = vmul.f32 %v282_v54, %v278_v58 }
 0x62c   :  { %v289_v61 = vadd.f32 %v287_v59, %v284_v60 }
 0x62e   :  { %v291_v62 = vmul.f32 0.2, %v289_v61  ;;  %vm290_vm15 = vcmp.ge.f32.partialorder %v289_v61, 0.0 }
 0x630   :  { %v292_v14 = vsel %vm290_vm15, %v289_v61, %v291_v62 }
 0x631   :  { %295 = vrot.lane.b32.xlu1 %v292_v14, %s479_s0  ;;  %293 = vst.msk [vmem:[#allocation2] sm:$0xff] %vm36_vm0, %v292_v14 }
 0x6a3   :  { %v296_v63 = vpop.permute.xlu1 %295 }
 0x6a4   :  { %298 = vst.msk [vmem:[#allocation2] sm:$0xff] %vm85_vm6, %v296_v63 }
 0x6ab   :  { %v299_v0 = vld [vmem:[#allocation2] sm:$0xff] }
 0x6ac   :  { %309 = vrot.lane.b32.xlu0 %v299_v0, %s484_s21  ;;  %325 = vst.msk [vmem:[#allocation3 + $0x30] sm:$0xff] %vm36_vm0, %v299_v0  ;;  %313 = vrot.lane.b32.xlu2 %v299_v0, %s480_s1 }
 0x6ad   :  { %321 = vrot.lane.b32.xlu1 %v299_v0, %s482_s19 }
 0x6b3   :  { %v332_v2 = vld [vmem:[#allocation3 + $0x30] sm:$0xff] }
 0x6b4   :  { %350 = vmatpush.msra.mxu2 %v332_v2  ;;  %335 = vperm.xlu0 %412, %v255_v6  }
 0x6b5   :  { %317 = vrot.lane.b32.xlu1 %v299_v0, %s481_s18 }
 0x6bd   :  { %305 = vrot.lane.b32.xlu1 %v299_v0, %s483_s20 }
 0x6c5   :  { %301 = vrot.lane.b32.xlu1 %v299_v0, %s485_s22 }
 0x706   :  { %v314_v3 = vpop.permute.xlu2 %313 }
 0x707   :  { %316 = vst.msk [vmem:[#allocation3 + $0x18] sm:$0xff] %vm36_vm0, %v314_v3 }
 0x70e   :  { %v329_v12 = vld [vmem:[#allocation3 + $0x18] sm:$0xff] }
 0x71e   :  { %v310_v4 = vpop.permute.xlu0 %309 }
 0x71f   :  { %312 = vst.msk [vmem:[#allocation3 + $0x10] sm:$0xff] %vm36_vm0, %v310_v4  ;;  %v322_v5 = vpop.permute.xlu1 %321 }
 0x720   :  { %324 = vst.msk [vmem:[#allocation3 + $0x28] sm:$0xff] %vm36_vm0, %v322_v5 }
 0x726   :  { %v328_v13 = vld [vmem:[#allocation3 + $0x10] sm:$0xff]  ;;  %v336_v19 = vpop.permute.xlu0 %335 }
 0x727   :  { %v318_v8 = vpop.permute.xlu1 %317  ;;  %v331_v9 = vld [vmem:[#allocation3 + $0x28] sm:$0xff] }
 0x728   :  { %320 = vst.msk [vmem:[#allocation3 + $0x20] sm:$0xff] %vm36_vm0, %v318_v8  ;;  %351 = vmatpush.msra.mxu2 %v331_v9 }
 0x72f   :  { %v306_v10 = vpop.permute.xlu1 %305  ;;  %v330_v11 = vld [vmem:[#allocation3 + $0x20] sm:$0xff] }
 0x730   :  { %308 = vst.msk [vmem:[#allocation3 + $0x8] sm:$0xff] %vm36_vm0, %v306_v10  ;;  %352 = vmatpush.msra.mxu2 %v330_v11 }
 0x732   :  { %353 = vmatpush.msra.mxu2 %v329_v12 }
 0x734   :  { %354 = vmatpush.msra.mxu2 %v328_v13 }
 0x737   :  { %v302_v15 = vpop.permute.xlu1 %301  ;;  %v327_v16 = vld [vmem:[#allocation3 + $0x8] sm:$0xff] }
 0x738   :  { %304 = vst.msk [vmem:[#allocation3] sm:$0xff] %vm36_vm0, %v302_v15  ;;  %355 = vmatpush.msra.mxu2 %v327_v16 }
 0x73f   :  { %v326_v18 = vld [vmem:[#allocation3] sm:$0xff] }
 0x740   :  { %356 = vmatpush.msra.mxu2 %v326_v18 }
 0x741   :  { %382 = vmatmul.msk.f32.vlgmr.msra.gmra.mxu2 %vm125_vm7, %v256_v17 }
 0x7c4   :  { %v358_v20 = vpop.f32.mrf.mxu2 }
 0x7c5   :  { %v359_v21 = vadd.f32 %v358_v20, %v336_v19 }
 0x7c7   :  { %362 = vst.msk [vmem:[#allocation8] sm:$0x3] %vm361_vm1, %v359_v21 }
 0x7c8   :  { %373 = dma.vmem_to_hbm [thread:$0]  %s369_s24, 32, %s371_s27, [#allocation7]  }
 0x7c9   :  { %471 = dma.done.wait [#allocation7], 32  }
 0x7ca   :  { %472 = vsyncadd [#allocation7], 4294967264 }
 0x7cb   :  { %378 = vsyncpa [#allocation6], 1 }
 0x7cc   :  { %379 = vsyncpa [#allocation7], 1 }

</bundles_post_ra>
